<compile_context>
chip_gen: v7x
topology: tpu7x:2x2x1
jax: 0.10.0
libtpu: 0.0.40
codegen_flags: <defaults>
</compile_context>

<pallas_src>
import math

import jax
import jax.numpy as jnp
from jax.experimental import pallas as pl
from jax.experimental.pallas import tpu as pltpu


def _round_up(x, m):
    return -(-x // m) * m


def conv_block_kernel(x_ref, w_ref, b_ref, o_ref):
    """Fused Conv1d + bias + ReLU on one lane-merged segment block.

    x_ref: (c_kp, W_in)          bf16  parity-packed input block (W_in = W_out + halo)
    w_ref: (kq, C_out_pad, c_kp) bf16  per-tap weight matrices
    b_ref: (C_out_pad, 1)        f32   bias
    o_ref: (C_out_pad, W_out)    f32   lane-dense output block (W_out % 128 == 0)
    """
    w_out = o_ref.shape[1]
    kq = w_ref.shape[0]
    # Tap 0 initializes the f32 accumulator; remaining taps are accumulated
    # dots against statically shifted lane slices (shift stays inside the
    # block thanks to the tail halo). kq = ceil(K/stride) is tiny and static.
    acc = jnp.dot(w_ref[0], x_ref[:, 0:w_out],
                  preferred_element_type=jnp.float32)
    for q in range(1, kq):
        acc = acc + jnp.dot(w_ref[q], x_ref[:, q:q + w_out],
                            preferred_element_type=jnp.float32)
    o_ref[...] = jnp.maximum(acc + b_ref[...], 0.0).astype(o_ref.dtype)
    # TODO(synk): nn.Dropout(p=0.2) is the identity in eval mode; training-mode
    # masking (pltpu.prng_seed + prng_random_bits, scale 1/(1-p)) not implemented.
    # normalization='none' => no BatchNorm branch.


def conv_block_forward(x_ncl, weight_ock, bias_o, *, stride=2, padding=0,
                       chunk_out=None, compute_dtype=jnp.bfloat16):
    """ConvBlock.forward (normalization='none'): Conv1d -> ReLU -> Dropout(eval)."""
    n, c_in, l = x_ncl.shape
    c_out, c_in_w, k_size = weight_ock.shape
    assert c_in == c_in_w
    s = int(stride)

    l_pad = l + 2 * padding
    l_out = (l_pad - k_size) // s + 1
    assert l_out > 0
    kq = -(-k_size // s)                        # taps after parity packing
    l_par = -(-l_pad // s)                      # parity-domain length
    assert kq - 1 <= 128                        # halo covers all tap shifts

    # bf16 inputs halve HBM bytes and feed the MXU at native rate on all gens;
    # accumulation / bias / ReLU stay in f32 inside the kernel.
    x = x_ncl.astype(compute_dtype)
    w = weight_ock.astype(compute_dtype)
    b = bias_o.astype(jnp.float32)

    # ---- parity-pack the stride into the channel axis ----------------------
    # TODO(synk): this pad + reshape/transpose is one extra HBM pass; a real
    # model should produce x already in packed layout upstream.
    if padding:
        x = jnp.pad(x, ((0, 0), (0, 0), (padding, padding)))
    if l_par * s != l_pad:
        x = jnp.pad(x, ((0, 0), (0, 0), (0, l_par * s - l_pad)))
    x_par = (x.reshape(n, c_in, l_par, s)
               .transpose(0, 3, 1, 2)           # (N, s, C_in, L_par)
               .reshape(n, s * c_in, l_par))
    c_k = s * c_in
    c_kp = _round_up(c_k, 16)                   # bf16 sublane packing
    c_out_p = _round_up(c_out, 8)               # f32 output sublanes
    if c_kp != c_k:
        x_par = jnp.pad(x_par, ((0, 0), (0, c_kp - c_k), (0, 0)))

    # w_q[o, p*C_in + c] = w[o, c, q*s + p]  (zero for phantom taps q*s+p >= K)
    w_pad = jnp.pad(w, ((0, 0), (0, 0), (0, kq * s - k_size)))
    w_taps = (w_pad.reshape(c_out, c_in, kq, s)
                   .transpose(0, 2, 3, 1)        # (C_out, kq, s, C_in)
                   .reshape(c_out, kq, c_k))
    w_taps = jnp.pad(w_taps, ((0, c_out_p - c_out), (0, 0), (0, c_kp - c_k)))
    w_taps = w_taps.transpose(1, 0, 2)           # (kq, C_out_pad, c_kp)
    b2 = jnp.pad(b, (0, c_out_p - c_out)).reshape(c_out_p, 1)

    # ---- merge (batch, L-chunk) segments onto one lane axis ----------------
    if chunk_out is None:
        chunk_out = min(l_out, 512, max(64, (1 << 17) // c_kp))   # VMEM bound
    chunk_out = max(1, min(int(chunk_out), l_out))
    t_chunks = -(-l_out // chunk_out)
    seg = _round_up(chunk_out + kq - 1, 8)       # per-segment lane stride

    l_need = (t_chunks - 1) * chunk_out + seg
    if x_par.shape[-1] < l_need:
        x_par = jnp.pad(x_par, ((0, 0), (0, 0), (0, l_need - x_par.shape[-1])))
    x_ch = jnp.stack([x_par[:, :, t * chunk_out: t * chunk_out + seg]
                      for t in range(t_chunks)], axis=1)   # (N, T, c_kp, SEG)
    x_m = x_ch.transpose(2, 0, 1, 3).reshape(c_kp, n * t_chunks * seg)

    n_segs = n * t_chunks
    # segments per grid step: W_out = spb*seg must be a multiple of 128 and
    # wide enough for lane-dense stores / full MXU pushes.
    gran = 128 // math.gcd(seg, 128)
    target_lanes = 512 if n_segs * seg >= 4096 else 256
    spb = gran
    while spb * seg < target_lanes:
        spb += gran
    n_segs_pad = _round_up(n_segs, spb)
    if n_segs_pad != n_segs:
        x_m = jnp.pad(x_m, ((0, 0), (0, (n_segs_pad - n_segs) * seg)))
    g_blocks = n_segs_pad // spb
    w_out_lanes = spb * seg                      # output block width (mult of 128)
    halo = 128                                   # >= kq-1 and keeps W_in % 128 == 0
    w_in_lanes = w_out_lanes + halo
    x_m = jnp.pad(x_m.reshape(c_kp, g_blocks, w_out_lanes),
                  ((0, 0), (0, 0), (0, halo))).reshape(c_kp, g_blocks * w_in_lanes)

    out_m = pl.pallas_call(
        conv_block_kernel,
        out_shape=jax.ShapeDtypeStruct((c_out_p, g_blocks * w_out_lanes),
                                       jnp.float32),
        grid=(g_blocks,),
        in_specs=[
            pl.BlockSpec((c_kp, w_in_lanes), lambda i: (0, i)),
            pl.BlockSpec((kq, c_out_p, c_kp), lambda i: (0, 0, 0)),
            pl.BlockSpec((c_out_p, 1), lambda i: (0, 0)),
        ],
        out_specs=pl.BlockSpec((c_out_p, w_out_lanes), lambda i: (0, i)),
        compiler_params=pltpu.CompilerParams(
            dimension_semantics=("parallel",),
            vmem_limit_bytes=48 * 1024 * 1024),
    )(x_m, w_taps, b2)

    # ---- un-merge back to PyTorch (N, C_out, L_out) layout ------------------
    out = (out_m.reshape(c_out_p, n_segs_pad, seg)[:, :n_segs, :chunk_out]
                .reshape(c_out_p, n, t_chunks, chunk_out)
                .transpose(1, 0, 2, 3)
                .reshape(n, c_out_p, t_chunks * chunk_out))
    return out[:, :c_out, :l_out]


def _reference(x_ncl, weight_ock, bias_o, *, stride, padding):
    out = jax.lax.conv_general_dilated(
        x_ncl, weight_ock,
        window_strides=(stride,),
        padding=[(padding, padding)],
        dimension_numbers=("NCH", "OIH", "NCH"))
    out = out + bias_o[None, :, None]
    return jnp.maximum(out, 0.0)


if __name__ == "__main__":
    # Small shapes consistent with ConvBlock: Conv1d input is (N, C_in, L).
    N, C_IN, C_OUT, K = 2, 4, 8, 3

    key = jax.random.PRNGKey(0)
    kw, kb, kx, kx2 = jax.random.split(key, 4)

    bound = 1.0 / math.sqrt(C_IN * K)
    weight = jax.random.uniform(kw, (C_OUT, C_IN, K), jnp.float32, -bound, bound)
    bias = jax.random.uniform(kb, (C_OUT,), jnp.float32, -bound, bound)
    x_small = jax.random.normal(kx, (N, C_IN, 16), jnp.float32)
    x_long = jax.random.normal(kx2, (N, C_IN, 260), jnp.float32)

    # Reference uses the same bf16-quantized x/w (kernel accumulates in f32),
    # so only summation-order differences remain.
    wq = weight.astype(jnp.bfloat16).astype(jnp.float32)

    cases = [
        (x_small, dict(stride=2, padding=0)),                 # module defaults
        (x_small, dict(stride=2, padding=1)),
        (x_small, dict(stride=1, padding=0)),
        (x_long, dict(stride=2, padding=0, chunk_out=64)),    # multi-chunk L tiling
    ]
    for x, kwargs in cases:
        out = conv_block_forward(x, weight, bias, **kwargs)
        out = jax.block_until_ready(out)
        xq = x.astype(jnp.bfloat16).astype(jnp.float32)
        ref = _reference(xq, wq, bias, stride=kwargs["stride"],
                         padding=kwargs["padding"])
        assert out.shape == ref.shape, (out.shape, ref.shape)
        assert jnp.allclose(out, ref, atol=1e-3, rtol=1e-3), (
            f"mismatch vs reference ({kwargs})")

    print("KERNEL_OK")
</pallas_src>

<mosaic_0001>
module attributes {stable_mosaic.version = 11 : i64} {
  func.func @conv_block_kernel(%arg0: i32, %arg1: memref<16x384xbf16, #tpu.memory_space<vmem>>, %arg2: memref<2x8x16xbf16, #tpu.memory_space<vmem>>, %arg3: memref<8x1xf32, #tpu.memory_space<vmem>>, %arg4: memref<8x256xf32, #tpu.memory_space<vmem>>) attributes {dimension_semantics = [#tpu.dimension_semantics<parallel>], iteration_bounds = array<i64: 1>, scalar_prefetch = 0 : i64, scratch_operands = 0 : i64, tpu.core_type = #tpu.core_type<tc>, window_params = [{transform_indices = @transform_0, window_bounds = array<i64: 16, 384>}, {pipeline_mode = #tpu.pipeline_mode<synchronous>, transform_indices = @transform_1, window_bounds = array<i64: 2, 8, 16>}, {pipeline_mode = #tpu.pipeline_mode<synchronous>, transform_indices = @transform_2, window_bounds = array<i64: 8, 1>}, {transform_indices = @transform_3, window_bounds = array<i64: 8, 256>}]} {
    %c0 = arith.constant 0 : index
    %c0_0 = arith.constant 0 : index
    %c0_1 = arith.constant 0 : index
    %0 = vector.load %arg2[%c0, %c0_0, %c0_1] : memref<2x8x16xbf16, #tpu.memory_space<vmem>>, vector<1x8x16xbf16>
    %1 = vector.shape_cast %0 : vector<1x8x16xbf16> to vector<8x16xbf16>
    %c0_2 = arith.constant 0 : index
    %c0_3 = arith.constant 0 : index
    %2 = vector.load %arg1[%c0_2, %c0_3] : memref<16x384xbf16, #tpu.memory_space<vmem>>, vector<16x256xbf16>
    %cst = arith.constant dense<0.000000e+00> : vector<8x256xf32>
    %3 = tpu.matmul %1, %2, %cst {dimension_numbers = #tpu.dot_dimension_numbers<[1], [0], [0], [1], [0, 0, 1, 1], [], []>} : vector<8x16xbf16>, vector<16x256xbf16>, vector<8x256xf32> -> vector<8x256xf32>
    %c1 = arith.constant 1 : index
    %c0_4 = arith.constant 0 : index
    %c0_5 = arith.constant 0 : index
    %4 = vector.load %arg2[%c1, %c0_4, %c0_5] : memref<2x8x16xbf16, #tpu.memory_space<vmem>>, vector<1x8x16xbf16>
    %5 = vector.shape_cast %4 : vector<1x8x16xbf16> to vector<8x16xbf16>
    %c0_6 = arith.constant 0 : index
    %c1_7 = arith.constant 1 : index
    %6 = vector.load %arg1[%c0_6, %c1_7] : memref<16x384xbf16, #tpu.memory_space<vmem>>, vector<16x256xbf16>
    %cst_8 = arith.constant dense<0.000000e+00> : vector<8x256xf32>
    %7 = tpu.matmul %5, %6, %cst_8 {dimension_numbers = #tpu.dot_dimension_numbers<[1], [0], [0], [1], [0, 0, 1, 1], [], []>} : vector<8x16xbf16>, vector<16x256xbf16>, vector<8x256xf32> -> vector<8x256xf32>
    %8 = arith.addf %3, %7 : vector<8x256xf32>
    %c0_9 = arith.constant 0 : index
    %c0_10 = arith.constant 0 : index
    %9 = vector.load %arg3[%c0_9, %c0_10] : memref<8x1xf32, #tpu.memory_space<vmem>>, vector<8x1xf32>
    %10 = vector.broadcast %9 : vector<8x1xf32> to vector<8x256xf32>
    %11 = arith.addf %8, %10 : vector<8x256xf32>
    %cst_11 = arith.constant 0.000000e+00 : f32
    %12 = vector.broadcast %cst_11 : f32 to vector<8x256xf32>
    %13 = arith.maximumf %11, %12 : vector<8x256xf32>
    %c0_12 = arith.constant 0 : index
    %c0_13 = arith.constant 0 : index
    %14 = vector.load %arg4[%c0_12, %c0_13] : memref<8x256xf32, #tpu.memory_space<vmem>>, vector<8x256xf32>
    tpu.vector_store %arg4[%c0_12, %c0_13], %13 {strides = array<i32>} : memref<8x256xf32, #tpu.memory_space<vmem>>, vector<8x256xf32>,
    return
  }
  func.func @transform_0(%arg0: i32) -> (i32, i32) {
    %c0_i32 = arith.constant 0 : i32
    %c0_i32_0 = arith.constant 0 : i32
    return %c0_i32, %arg0 : i32, i32
  }
  func.func @transform_1(%arg0: i32) -> (i32, i32, i32) {
    %c0_i32 = arith.constant 0 : i32
    %c0_i32_0 = arith.constant 0 : i32
    %c0_i32_1 = arith.constant 0 : i32
    %c0_i32_2 = arith.constant 0 : i32
    return %c0_i32, %c0_i32_0, %c0_i32_1 : i32, i32, i32
  }
  func.func @transform_2(%arg0: i32) -> (i32, i32) {
    %c0_i32 = arith.constant 0 : i32
    %c0_i32_0 = arith.constant 0 : i32
    %c0_i32_1 = arith.constant 0 : i32
    return %c0_i32, %c0_i32_0 : i32, i32
  }
  func.func @transform_3(%arg0: i32) -> (i32, i32) {
    %c0_i32 = arith.constant 0 : i32
    %c0_i32_0 = arith.constant 0 : i32
    return %c0_i32, %arg0 : i32, i32
  }
}

</mosaic_0001>

<bundles_post_ra>
// kernel: tpu_custom_call.1
= control target key start
LH: loop header
LB: loop body
LE: loop exit
PB: predicated region body
PF: predicated region fallthrough
CT: control target
= control target key end

     0   :  { %8 = vsyncpa [#allocation3], 0  ;;  %s316_s0 = inlined_call_operand.hbm [shape: bf16[16,384], index: 0, kind: input, shape index: {}]   ;;  %s317_s1 = inlined_call_operand.vmem [shape: bf16[2,8,16], index: 1, kind: input, shape index: {}]   ;;  %s318_s2 = inlined_call_operand.vmem [shape: f32[8,1], index: 2, kind: input, shape index: {}]   ;;  %s319_s3 = inlined_call_operand.hbm [shape: f32[8,256], index: 3, kind: output, shape index: {}]  }
   0x1   :  { %9 = vsyncpa [#allocation4], 0  ;;  %s257_s12 = smov [#allocation2]   ;;  %s209_s16 = scalar_lea.hbm %s316_s0, 384 }
   0x2   :  { %s15_s13 = sshll.u32 %s257_s12, 4  ;;  %p210_p0 = scmp.ne.s32.totalorder %s316_s0, %s209_s16  ;;  %s16_s13 = int_to_ptr.vmem [resolvable:$true] %s15_s13 }
   0x3   :  { %p213_p1 = scmp.lt.u32.totalorder %s209_s16, %s316_s0 }
   0x5   :  { %p215_p2 = pnand %p213_p1, %p210_p0 }
   0x7   :  { %218 = shalt.err (!%p215_p2)
}
   0x8   :  { %s219_s21 = scalar_lea.vmem %s16_s13, 384  ;;  %p224_p4 = scmp.lt.s32.totalorder %s16_s13, %s16_s13 }
   0x9   :  { %p220_p3 = scmp.ne.s32.totalorder %s16_s13, %s219_s21  ;;  %p225_p5 = scmp.lt.s32.totalorder %s219_s21, %s219_s21 }
   0xb   :  { %p226_p6 = por %p225_p5, %p224_p4 }
   0xd   :  { %p227_p7 = pnand %p226_p6, %p220_p3 }
   0xf   :  { %230 = shalt.err (!%p227_p7)
}
  0x10   :  { %s258_s22 = smov 192   ;;  %s259_s23 = smov 12  }
  0x11   :  { %21 = dma.hbm_to_vmem [thread:$0]  %s316_s0, 384, %s16_s13, [#allocation3], %s258_s22, %s258_s22, %s259_s23  }
  0x12   :  { %253 = dma.done.wait [#allocation3], 384  }
  0x13   :  { %254 = vsyncadd [#allocation3], 4294966912  ;;  %v260_v0 = vmov 0   ;;  %v205_v1 = vld [vmem:[#allocation2 + $0x4] ss:$12 sps:$4 sm:$0xff]   ;;  %s261_s26 = smov 127  }
  0x14   :  { %153 = vmatprep.mubr.bf16.mxu1 %v260_v0  ;;  %99 = vmatprep.mubr.bf16.mxu0 %v260_v0  ;;  %v207_v2 = vld [vmem:[#allocation2] ss:$12 sps:$4 sm:$0xff]   ;;  %v208_v3 = vld [vmem:[#allocation2 + $0x8] ss:$12 sps:$4 sm:$0xff]   ;;  %vm63_vm0 = vcmask 130048   ;;  %vm58_vm1 = vcmask 1039360  }
  0x15   :  { %203 = vset.pattern.permute.xlu1 %v260_v0  ;;  %204 = vset.pattern.permute.xlu0 %v260_v0  ;;  %v30_v4 = vld [vmem:[%s317_s1] sm:$0xf]  ;;  %v189_v11 = vld [vmem:[%s317_s1 + $0x4] sm:$0xf] }
  0x16   :  { %54 = vrot.lane.b32.xlu0 %v205_v1, %s261_s26  ;;  %121 = vmatprep.subr.bf16.mxu1 %v205_v1  ;;  %v162_v5 = vld [vmem:[%s318_s2] sm:$0xff]  ;;  %s262_s2 = smov [#allocation5]  }
  0x17   :  { %52 = vrot.lane.b32.xlu1 %v207_v2, %s261_s26  ;;  %122 = vmatpush1.bf16.msra.mxu1 %v207_v2  ;;  %s180_s5 = sshll.u32 %s262_s2, 4  ;;  %s181_s5 = int_to_ptr.vmem [resolvable:$true] %s180_s5 }
  0x18   :  { %s231_s1 = scalar_lea.vmem %s181_s5, 256  ;;  %p236_p9 = scmp.lt.s32.totalorder %s181_s5, %s181_s5 }
  0x19   :  { %p232_p8 = scmp.ne.s32.totalorder %s181_s5, %s231_s1  ;;  %p237_p10 = scmp.lt.s32.totalorder %s231_s1, %s231_s1 }
  0x1a   :  { %56 = vrot.lane.b32.xlu0 %v208_v3, %s261_s26  ;;  %196 = vmatmul.mubr.msk.bf16.vlgmr.msra.gmra.mrb[0].mxu1 %vm63_vm0, %v30_v4 }
  0x1b   :  { %165 = vperm.xlu1 %203, %v162_v5   ;;  %p238_p11 = por %p237_p10, %p236_p9 }
  0x1d   :  { %p239_p12 = pnand %p238_p11, %p232_p8 }
  0x88   :  { %v55_v6 = vpop.permute.xlu0 %54 }
  0x89   :  { %v53_v7 = vpop.permute.xlu1 %52 }
  0x8a   :  { %v59_v10 = vsel %vm58_vm1, %v53_v7, %v55_v6 }
  0x8c   :  { %v57_v8 = vpop.permute.xlu0 %56 }
  0x8d   :  { %v60_v9 = vsel %vm58_vm1, %v55_v6, %v57_v8 }
  0x8e   :  { %67 = vmatprep.subr.bf16.mxu0 %v60_v9 }
  0x8f   :  { %68 = vmatpush1.bf16.msra.mxu0 %v59_v10 }
  0x92   :  { %193 = vmatmul.mubr.msk.bf16.vlgmr.msra.gmra.mrb[0].mxu0 %vm63_vm0, %v189_v11 }
  0x9a   :  { %v166_v17 = vpop.permute.xlu1 %165 }
  0xed   :  { %v155_v12 = vpop.f32.mrb[0].mxu1 }
  0xee   :  { %v157_v13 = vpop.f32.mrb[1].mxu1 }
  0xef   :  { %v159_v14 = vpop.f32.mrb[2].mxu1 }
  0xf0   :  { %v160_v15 = vpop.f32.mrb[3].mxu1 }
 0x165   :  { %v101_v16 = vpop.f32.mrb[0].mxu0 }
 0x166   :  { %v156_v18 = vadd.f32 %v155_v12, %v101_v16  ;;  %v103_v19 = vpop.f32.mrb[1].mxu0 }
 0x167   :  { %v158_v20 = vadd.f32 %v157_v13, %v103_v19  ;;  %v105_v21 = vpop.f32.mrb[2].mxu0 }
 0x168   :  { %v168_v22 = vadd.f32 %v166_v17, %v156_v18  ;;  %v106_v23 = vpop.f32.mrb[3].mxu0 }
 0x169   :  { %v169_v24 = vadd.f32 %v166_v17, %v158_v20 }
 0x16a   :  { %v170_v25 = vmax.f32 %v168_v22, 0.0 }
 0x16b   :  { %v171_v26 = vmax.f32 %v169_v24, 0.0 }
 0x16c   :  { %172 = vst [vmem:[#allocation5] sm:$0xff] %v170_v25 }
 0x16d   :  { %173 = vst [vmem:[#allocation5 + $0x8] sm:$0xff] %v171_v26 }
 0x16e   :  { %242 = shalt.err (!%p239_p12)
}
 0x16f   :  { %s243_s8 = scalar_lea.hbm %s319_s3, 256 }
 0x170   :  { %p244_p13 = scmp.ne.s32.totalorder %s319_s3, %s243_s8  ;;  %p247_p0 = scmp.lt.u32.totalorder %s243_s8, %s319_s3 }
 0x172   :  { %p249_p1 = pnand %p247_p0, %p244_p13 }
 0x174   :  { %252 = shalt.err (!%p249_p1)
}
 0x175   :  { %183 = dma.vmem_to_hbm [thread:$0]  %s181_s5, 256, %s319_s3, [#allocation4]  }
 0x176   :  { %255 = dma.done.wait [#allocation4], 256  }
 0x177   :  { %256 = vsyncadd [#allocation4], 4294967040 }
 0x178   :  { %187 = vsyncpa [#allocation3], 1 }
 0x179   :  { %188 = vsyncpa [#allocation4], 1 }

</bundles_post_ra>
